<compile_context>
chip_gen: v7x
topology: tpu7x:2x2x1
jax: 0.10.0
libtpu: 0.0.40
codegen_flags: <defaults>
</compile_context>

<pallas_src>
import jax
import jax.numpy as jnp
import numpy as np
from jax.experimental import pallas as pl
from jax.experimental.pallas import tpu as pltpu


def _round_up(n, m):
    return ((n + m - 1) // m) * m


def _pad_rows(a, rows):
    pad = rows - a.shape[0]
    return jnp.pad(a, ((0, pad), (0, 0))) if pad else a


def _pack_rnn_weights(layers, hidden_size):
    """Pack [W_ih, W_hh, b] of every layer into one (R, H) buffer.

    Every segment starts at an 8-row-aligned offset so static in-kernel slices
    never cross a sublane-tile boundary (no relayout copies)."""
    segs, offsets, cur = [], [], 0
    for (w_ih, w_hh, b) in layers:
        in_feat = w_ih.shape[0]
        r_ih = _round_up(in_feat, 8)
        r_hh = _round_up(hidden_size, 8)
        off_ih, off_hh, off_b = cur, cur + r_ih, cur + r_ih + r_hh
        segs += [_pad_rows(w_ih, r_ih), _pad_rows(w_hh, r_hh), _pad_rows(b, 8)]
        cur = off_b + 8
        offsets.append((off_ih, in_feat, off_hh, off_b))
    return jnp.concatenate(segs, axis=0), tuple(offsets)


def _make_rnn_kernel(num_layers, seq_len, batch, hidden_size, num_classes,
                     rnn_offsets):
    H, B, C = hidden_size, batch, num_classes

    def kernel(x_ref, w_rnn_ref, w_fc_ref, out_ref):
        # ---- hoisted weight / bias loads (static, 8-row-aligned slices) ----
        w_ih, w_hh, b_bc = [], [], []
        for l in range(num_layers):
            off_ih, in_feat, off_hh, off_b = rnn_offsets[l]
            w_ih.append(w_rnn_ref[off_ih:off_ih + in_feat, :])
            w_hh.append(w_rnn_ref[off_hh:off_hh + H, :])
            if l == 0:
                b_bc.append(None)  # layer-0 bias is folded into x_proj below
            else:
                b_bc.append(
                    jnp.broadcast_to(w_rnn_ref[off_b:off_b + 1, :], (B, H)))
        w_fc = w_fc_ref[0:H, :]
        b_fc = jnp.broadcast_to(w_fc_ref[H:H + 1, :], (B, C))

        # ---- layer-0 input projection hoisted out of the time loop:
        # one (S*B, I) @ (I, H) MXU pass, bias folded in, off the critical chain.
        off_b0 = rnn_offsets[0][3]
        x_proj = (jnp.dot(x_ref[...], w_ih[0],
                          preferred_element_type=jnp.float32)
                  + w_rnn_ref[off_b0:off_b0 + 1, :])          # (S*B, H)

        # ---- recurrent time loop (fully unrolled; live ranges are tiny) ----
        h = [jnp.zeros((B, H), jnp.float32) for _ in range(num_layers)]
        for t in range(seq_len):
            # Layer 0: only the recurrent dot is on the serial chain.
            h[0] = jnp.tanh(
                x_proj[t * B:(t + 1) * B, :]
                + jnp.dot(h[0], w_hh[0], preferred_element_type=jnp.float32))
            xt = h[0]
            for l in range(1, num_layers):
                # Two separate dots (no lane-axis concat on the chain).
                h[l] = jnp.tanh(
                    jnp.dot(xt, w_ih[l], preferred_element_type=jnp.float32)
                    + jnp.dot(h[l], w_hh[l], preferred_element_type=jnp.float32)
                    + b_bc[l])
                xt = h[l]

        # nn.Dropout(p=0.4) is identity in eval/inference mode.
        # TODO(synk): training-mode dropout (random mask + 1/(1-p) scale) not implemented.
        out_ref[...] = (jnp.dot(h[-1], w_fc, preferred_element_type=jnp.float32)
                        + b_fc)

    return kernel


def rnn_forward(x, params, hidden_size, num_classes):
    """Pallas RNN forward. x: (B, S, I) float32. Returns (B, num_classes)."""
    B, S, I = x.shape
    num_layers = len(params["layers"])
    H, C = hidden_size, num_classes

    # (B,S,I) -> (S,B,I) -> (S*B, I): rows [t*B:(t+1)*B] are timestep t.
    x_flat = jnp.transpose(x, (1, 0, 2)).reshape(S * B, I)

    w_rnn, rnn_offsets = _pack_rnn_weights(params["layers"], H)
    w_fc, b_fc = params["fc"]
    w_fc_packed = jnp.concatenate(
        [_pad_rows(w_fc, _round_up(H, 8)), _pad_rows(b_fc, 8)], axis=0)

    kernel = _make_rnn_kernel(num_layers, S, B, H, C, rnn_offsets)

    # Advisory cost hint for the XLA scheduler.
    flops = 2 * S * B * I * H + 2 * S * B * H * H            # layer 0
    flops += (num_layers - 1) * 2 * 2 * S * B * H * H        # layers >= 1
    flops += 2 * B * H * C                                    # fc head
    transcendentals = S * num_layers * B * H
    bytes_accessed = 4 * (x_flat.size + w_rnn.size + w_fc_packed.size + B * C)

    vmem = pl.BlockSpec(memory_space=pltpu.MemorySpace.VMEM)
    out = pl.pallas_call(
        kernel,
        out_shape=jax.ShapeDtypeStruct((B, C), jnp.float32),
        in_specs=[vmem, vmem, vmem],
        out_specs=vmem,
        cost_estimate=pl.CostEstimate(flops=flops,
                                      transcendentals=transcendentals,
                                      bytes_accessed=bytes_accessed),
    )(x_flat, w_rnn, w_fc_packed)
    return out


def init_params(key, input_size, hidden_size, num_classes, num_layers):
    """Mimics the PyTorch module: recurrent Linears uniform +-1/sqrt(fan_in)
    (bias=False), RNNCell.bias = zeros, fc has default Linear init.
    Weights stored pre-transposed: (in_features, out_features)."""
    layers = []
    for i in range(num_layers):
        in_feat = input_size if i == 0 else hidden_size
        key, k1, k2 = jax.random.split(key, 3)
        bound_ih = 1.0 / np.sqrt(in_feat)
        bound_hh = 1.0 / np.sqrt(hidden_size)
        w_ih = jax.random.uniform(k1, (in_feat, hidden_size), jnp.float32,
                                  -bound_ih, bound_ih)
        w_hh = jax.random.uniform(k2, (hidden_size, hidden_size), jnp.float32,
                                  -bound_hh, bound_hh)
        b = jnp.zeros((1, hidden_size), jnp.float32)
        layers.append((w_ih, w_hh, b))
    key, k3, k4 = jax.random.split(key, 3)
    bound_fc = 1.0 / np.sqrt(hidden_size)
    w_fc = jax.random.uniform(k3, (hidden_size, num_classes), jnp.float32,
                              -bound_fc, bound_fc)
    b_fc = jax.random.uniform(k4, (1, num_classes), jnp.float32,
                              -bound_fc, bound_fc)
    return {"layers": layers, "fc": (w_fc, b_fc)}


def rnn_forward_ref(x, params):
    """Pure-JAX reference mirroring the PyTorch forward (eval mode)."""
    B = x.shape[0]
    num_layers = len(params["layers"])
    H = params["layers"][0][1].shape[0]
    h = [jnp.zeros((B, H), jnp.float32) for _ in range(num_layers)]
    for t in range(x.shape[1]):
        xt = x[:, t, :]
        for layer in range(num_layers):
            w_ih, w_hh, b = params["layers"][layer]
            h[layer] = jnp.tanh(xt @ w_ih + h[layer] @ w_hh + b)
            xt = h[layer]
    w_fc, b_fc = params["fc"]
    return h[-1] @ w_fc + b_fc


if __name__ == "__main__":
    batch, seq, input_size = 2, 8, 16
    hidden_size, num_classes, num_layers = 32, 10, 2

    key = jax.random.PRNGKey(0)
    key, kx = jax.random.split(key)
    x = jax.random.normal(kx, (batch, seq, input_size), jnp.float32)
    params = init_params(key, input_size, hidden_size, num_classes, num_layers)

    out = jax.block_until_ready(rnn_forward(x, params, hidden_size, num_classes))
    ref = jax.block_until_ready(rnn_forward_ref(x, params))
    np.testing.assert_allclose(np.asarray(out), np.asarray(ref),
                               rtol=1e-5, atol=1e-5)
    print("KERNEL_OK")
</pallas_src>

<mosaic_0001>
module attributes {stable_mosaic.version = 11 : i64} {
  func.func @kernel(%arg0: memref<16x16xf32, #tpu.memory_space<vmem>>, %arg1: memref<128x32xf32, #tpu.memory_space<vmem>>, %arg2: memref<40x10xf32, #tpu.memory_space<vmem>>, %arg3: memref<2x10xf32, #tpu.memory_space<vmem>>) attributes {dimension_semantics = [], scalar_prefetch = 0 : i64, scratch_operands = 0 : i64, tpu.core_type = #tpu.core_type<tc>} {
    %c0 = arith.constant 0 : index
    %c0_0 = arith.constant 0 : index
    %0 = vector.load %arg1[%c0, %c0_0] : memref<128x32xf32, #tpu.memory_space<vmem>>, vector<16x32xf32>
    %c16 = arith.constant 16 : index
    %c0_1 = arith.constant 0 : index
    %1 = vector.load %arg1[%c16, %c0_1] : memref<128x32xf32, #tpu.memory_space<vmem>>, vector<32x32xf32>
    %c56 = arith.constant 56 : index
    %c0_2 = arith.constant 0 : index
    %2 = vector.load %arg1[%c56, %c0_2] : memref<128x32xf32, #tpu.memory_space<vmem>>, vector<32x32xf32>
    %c88 = arith.constant 88 : index
    %c0_3 = arith.constant 0 : index
    %3 = vector.load %arg1[%c88, %c0_3] : memref<128x32xf32, #tpu.memory_space<vmem>>, vector<32x32xf32>
    %c120 = arith.constant 120 : index
    %c0_4 = arith.constant 0 : index
    %4 = vector.load %arg1[%c120, %c0_4] : memref<128x32xf32, #tpu.memory_space<vmem>>, vector<1x32xf32>
    %5 = vector.shape_cast %4 : vector<1x32xf32> to vector<1x32xf32>
    %6 = vector.broadcast %5 : vector<1x32xf32> to vector<2x32xf32>
    %c0_5 = arith.constant 0 : index
    %c0_6 = arith.constant 0 : index
    %7 = vector.load %arg2[%c0_5, %c0_6] : memref<40x10xf32, #tpu.memory_space<vmem>>, vector<32x10xf32>
    %c32 = arith.constant 32 : index
    %c0_7 = arith.constant 0 : index
    %8 = vector.load %arg2[%c32, %c0_7] : memref<40x10xf32, #tpu.memory_space<vmem>>, vector<1x10xf32>
    %9 = vector.shape_cast %8 : vector<1x10xf32> to vector<1x10xf32>
    %10 = vector.broadcast %9 : vector<1x10xf32> to vector<2x10xf32>
    %c0_8 = arith.constant 0 : index
    %c0_9 = arith.constant 0 : index
    %11 = vector.load %arg0[%c0_8, %c0_9] : memref<16x16xf32, #tpu.memory_space<vmem>>, vector<16x16xf32>
    %cst = arith.constant dense<0.000000e+00> : vector<16x32xf32>
    %12 = tpu.matmul %11, %0, %cst {dimension_numbers = #tpu.dot_dimension_numbers<[1], [0], [0], [1], [0, 0, 1, 1], [], []>} : vector<16x16xf32>, vector<16x32xf32>, vector<16x32xf32> -> vector<16x32xf32>
    %c48 = arith.constant 48 : index
    %c0_10 = arith.constant 0 : index
    %13 = vector.load %arg1[%c48, %c0_10] : memref<128x32xf32, #tpu.memory_space<vmem>>, vector<1x32xf32>
    %14 = vector.broadcast %13 : vector<1x32xf32> to vector<16x32xf32>
    %15 = arith.addf %12, %14 : vector<16x32xf32>
    %cst_11 = arith.constant 0.000000e+00 : f32
    %16 = vector.broadcast %cst_11 : f32 to vector<2x32xf32>
    %cst_12 = arith.constant 0.000000e+00 : f32
    %17 = vector.broadcast %cst_12 : f32 to vector<2x32xf32>
    %18 = vector.extract_strided_slice %15 {offsets = [0, 0], sizes = [2, 32], strides = [1, 1]} : vector<16x32xf32> to vector<2x32xf32>
    %cst_13 = arith.constant dense<0.000000e+00> : vector<2x32xf32>
    %19 = tpu.matmul %16, %1, %cst_13 {dimension_numbers = #tpu.dot_dimension_numbers<[1], [0], [0], [1], [0, 0, 1, 1], [], []>} : vector<2x32xf32>, vector<32x32xf32>, vector<2x32xf32> -> vector<2x32xf32>
    %20 = arith.addf %18, %19 : vector<2x32xf32>
    %21 = math.tanh %20 : vector<2x32xf32>
    %cst_14 = arith.constant dense<0.000000e+00> : vector<2x32xf32>
    %22 = tpu.matmul %21, %2, %cst_14 {dimension_numbers = #tpu.dot_dimension_numbers<[1], [0], [0], [1], [0, 0, 1, 1], [], []>} : vector<2x32xf32>, vector<32x32xf32>, vector<2x32xf32> -> vector<2x32xf32>
    %cst_15 = arith.constant dense<0.000000e+00> : vector<2x32xf32>
    %23 = tpu.matmul %17, %3, %cst_15 {dimension_numbers = #tpu.dot_dimension_numbers<[1], [0], [0], [1], [0, 0, 1, 1], [], []>} : vector<2x32xf32>, vector<32x32xf32>, vector<2x32xf32> -> vector<2x32xf32>
    %24 = arith.addf %22, %23 : vector<2x32xf32>
    %25 = arith.addf %24, %6 : vector<2x32xf32>
    %26 = math.tanh %25 : vector<2x32xf32>
    %27 = vector.extract_strided_slice %15 {offsets = [2, 0], sizes = [2, 32], strides = [1, 1]} : vector<16x32xf32> to vector<2x32xf32>
    %cst_16 = arith.constant dense<0.000000e+00> : vector<2x32xf32>
    %28 = tpu.matmul %21, %1, %cst_16 {dimension_numbers = #tpu.dot_dimension_numbers<[1], [0], [0], [1], [0, 0, 1, 1], [], []>} : vector<2x32xf32>, vector<32x32xf32>, vector<2x32xf32> -> vector<2x32xf32>
    %29 = arith.addf %27, %28 : vector<2x32xf32>
    %30 = math.tanh %29 : vector<2x32xf32>
    %cst_17 = arith.constant dense<0.000000e+00> : vector<2x32xf32>
    %31 = tpu.matmul %30, %2, %cst_17 {dimension_numbers = #tpu.dot_dimension_numbers<[1], [0], [0], [1], [0, 0, 1, 1], [], []>} : vector<2x32xf32>, vector<32x32xf32>, vector<2x32xf32> -> vector<2x32xf32>
    %cst_18 = arith.constant dense<0.000000e+00> : vector<2x32xf32>
    %32 = tpu.matmul %26, %3, %cst_18 {dimension_numbers = #tpu.dot_dimension_numbers<[1], [0], [0], [1], [0, 0, 1, 1], [], []>} : vector<2x32xf32>, vector<32x32xf32>, vector<2x32xf32> -> vector<2x32xf32>
    %33 = arith.addf %31, %32 : vector<2x32xf32>
    %34 = arith.addf %33, %6 : vector<2x32xf32>
    %35 = math.tanh %34 : vector<2x32xf32>
    %36 = vector.extract_strided_slice %15 {offsets = [4, 0], sizes = [2, 32], strides = [1, 1]} : vector<16x32xf32> to vector<2x32xf32>
    %cst_19 = arith.constant dense<0.000000e+00> : vector<2x32xf32>
    %37 = tpu.matmul %30, %1, %cst_19 {dimension_numbers = #tpu.dot_dimension_numbers<[1], [0], [0], [1], [0, 0, 1, 1], [], []>} : vector<2x32xf32>, vector<32x32xf32>, vector<2x32xf32> -> vector<2x32xf32>
    %38 = arith.addf %36, %37 : vector<2x32xf32>
    %39 = math.tanh %38 : vector<2x32xf32>
    %cst_20 = arith.constant dense<0.000000e+00> : vector<2x32xf32>
    %40 = tpu.matmul %39, %2, %cst_20 {dimension_numbers = #tpu.dot_dimension_numbers<[1], [0], [0], [1], [0, 0, 1, 1], [], []>} : vector<2x32xf32>, vector<32x32xf32>, vector<2x32xf32> -> vector<2x32xf32>
    %cst_21 = arith.constant dense<0.000000e+00> : vector<2x32xf32>
    %41 = tpu.matmul %35, %3, %cst_21 {dimension_numbers = #tpu.dot_dimension_numbers<[1], [0], [0], [1], [0, 0, 1, 1], [], []>} : vector<2x32xf32>, vector<32x32xf32>, vector<2x32xf32> -> vector<2x32xf32>
    %42 = arith.addf %40, %41 : vector<2x32xf32>
    %43 = arith.addf %42, %6 : vector<2x32xf32>
    %44 = math.tanh %43 : vector<2x32xf32>
    %45 = vector.extract_strided_slice %15 {offsets = [6, 0], sizes = [2, 32], strides = [1, 1]} : vector<16x32xf32> to vector<2x32xf32>
    %cst_22 = arith.constant dense<0.000000e+00> : vector<2x32xf32>
    %46 = tpu.matmul %39, %1, %cst_22 {dimension_numbers = #tpu.dot_dimension_numbers<[1], [0], [0], [1], [0, 0, 1, 1], [], []>} : vector<2x32xf32>, vector<32x32xf32>, vector<2x32xf32> -> vector<2x32xf32>
    %47 = arith.addf %45, %46 : vector<2x32xf32>
    %48 = math.tanh %47 : vector<2x32xf32>
    %cst_23 = arith.constant dense<0.000000e+00> : vector<2x32xf32>
    %49 = tpu.matmul %48, %2, %cst_23 {dimension_numbers = #tpu.dot_dimension_numbers<[1], [0], [0], [1], [0, 0, 1, 1], [], []>} : vector<2x32xf32>, vector<32x32xf32>, vector<2x32xf32> -> vector<2x32xf32>
    %cst_24 = arith.constant dense<0.000000e+00> : vector<2x32xf32>
    %50 = tpu.matmul %44, %3, %cst_24 {dimension_numbers = #tpu.dot_dimension_numbers<[1], [0], [0], [1], [0, 0, 1, 1], [], []>} : vector<2x32xf32>, vector<32x32xf32>, vector<2x32xf32> -> vector<2x32xf32>
    %51 = arith.addf %49, %50 : vector<2x32xf32>
    %52 = arith.addf %51, %6 : vector<2x32xf32>
    %53 = math.tanh %52 : vector<2x32xf32>
    %54 = vector.extract_strided_slice %15 {offsets = [8, 0], sizes = [2, 32], strides = [1, 1]} : vector<16x32xf32> to vector<2x32xf32>
    %cst_25 = arith.constant dense<0.000000e+00> : vector<2x32xf32>
    %55 = tpu.matmul %48, %1, %cst_25 {dimension_numbers = #tpu.dot_dimension_numbers<[1], [0], [0], [1], [0, 0, 1, 1], [], []>} : vector<2x32xf32>, vector<32x32xf32>, vector<2x32xf32> -> vector<2x32xf32>
    %56 = arith.addf %54, %55 : vector<2x32xf32>
    %57 = math.tanh %56 : vector<2x32xf32>
    %cst_26 = arith.constant dense<0.000000e+00> : vector<2x32xf32>
    %58 = tpu.matmul %57, %2, %cst_26 {dimension_numbers = #tpu.dot_dimension_numbers<[1], [0], [0], [1], [0, 0, 1, 1], [], []>} : vector<2x32xf32>, vector<32x32xf32>, vector<2x32xf32> -> vector<2x32xf32>
    %cst_27 = arith.constant dense<0.000000e+00> : vector<2x32xf32>
    %59 = tpu.matmul %53, %3, %cst_27 {dimension_numbers = #tpu.dot_dimension_numbers<[1], [0], [0], [1], [0, 0, 1, 1], [], []>} : vector<2x32xf32>, vector<32x32xf32>, vector<2x32xf32> -> vector<2x32xf32>
    %60 = arith.addf %58, %59 : vector<2x32xf32>
    %61 = arith.addf %60, %6 : vector<2x32xf32>
    %62 = math.tanh %61 : vector<2x32xf32>
    %63 = vector.extract_strided_slice %15 {offsets = [10, 0], sizes = [2, 32], strides = [1, 1]} : vector<16x32xf32> to vector<2x32xf32>
    %cst_28 = arith.constant dense<0.000000e+00> : vector<2x32xf32>
    %64 = tpu.matmul %57, %1, %cst_28 {dimension_numbers = #tpu.dot_dimension_numbers<[1], [0], [0], [1], [0, 0, 1, 1], [], []>} : vector<2x32xf32>, vector<32x32xf32>, vector<2x32xf32> -> vector<2x32xf32>
    %65 = arith.addf %63, %64 : vector<2x32xf32>
    %66 = math.tanh %65 : vector<2x32xf32>
    %cst_29 = arith.constant dense<0.000000e+00> : vector<2x32xf32>
    %67 = tpu.matmul %66, %2, %cst_29 {dimension_numbers = #tpu.dot_dimension_numbers<[1], [0], [0], [1], [0, 0, 1, 1], [], []>} : vector<2x32xf32>, vector<32x32xf32>, vector<2x32xf32> -> vector<2x32xf32>
    %cst_30 = arith.constant dense<0.000000e+00> : vector<2x32xf32>
    %68 = tpu.matmul %62, %3, %cst_30 {dimension_numbers = #tpu.dot_dimension_numbers<[1], [0], [0], [1], [0, 0, 1, 1], [], []>} : vector<2x32xf32>, vector<32x32xf32>, vector<2x32xf32> -> vector<2x32xf32>
    %69 = arith.addf %67, %68 : vector<2x32xf32>
    %70 = arith.addf %69, %6 : vector<2x32xf32>
    %71 = math.tanh %70 : vector<2x32xf32>
    %72 = vector.extract_strided_slice %15 {offsets = [12, 0], sizes = [2, 32], strides = [1, 1]} : vector<16x32xf32> to vector<2x32xf32>
    %cst_31 = arith.constant dense<0.000000e+00> : vector<2x32xf32>
    %73 = tpu.matmul %66, %1, %cst_31 {dimension_numbers = #tpu.dot_dimension_numbers<[1], [0], [0], [1], [0, 0, 1, 1], [], []>} : vector<2x32xf32>, vector<32x32xf32>, vector<2x32xf32> -> vector<2x32xf32>
    %74 = arith.addf %72, %73 : vector<2x32xf32>
    %75 = math.tanh %74 : vector<2x32xf32>
    %cst_32 = arith.constant dense<0.000000e+00> : vector<2x32xf32>
    %76 = tpu.matmul %75, %2, %cst_32 {dimension_numbers = #tpu.dot_dimension_numbers<[1], [0], [0], [1], [0, 0, 1, 1], [], []>} : vector<2x32xf32>, vector<32x32xf32>, vector<2x32xf32> -> vector<2x32xf32>
    %cst_33 = arith.constant dense<0.000000e+00> : vector<2x32xf32>
    %77 = tpu.matmul %71, %3, %cst_33 {dimension_numbers = #tpu.dot_dimension_numbers<[1], [0], [0], [1], [0, 0, 1, 1], [], []>} : vector<2x32xf32>, vector<32x32xf32>, vector<2x32xf32> -> vector<2x32xf32>
    %78 = arith.addf %76, %77 : vector<2x32xf32>
    %79 = arith.addf %78, %6 : vector<2x32xf32>
    %80 = math.tanh %79 : vector<2x32xf32>
    %81 = vector.extract_strided_slice %15 {offsets = [14, 0], sizes = [2, 32], strides = [1, 1]} : vector<16x32xf32> to vector<2x32xf32>
    %cst_34 = arith.constant dense<0.000000e+00> : vector<2x32xf32>
    %82 = tpu.matmul %75, %1, %cst_34 {dimension_numbers = #tpu.dot_dimension_numbers<[1], [0], [0], [1], [0, 0, 1, 1], [], []>} : vector<2x32xf32>, vector<32x32xf32>, vector<2x32xf32> -> vector<2x32xf32>
    %83 = arith.addf %81, %82 : vector<2x32xf32>
    %84 = math.tanh %83 : vector<2x32xf32>
    %cst_35 = arith.constant dense<0.000000e+00> : vector<2x32xf32>
    %85 = tpu.matmul %84, %2, %cst_35 {dimension_numbers = #tpu.dot_dimension_numbers<[1], [0], [0], [1], [0, 0, 1, 1], [], []>} : vector<2x32xf32>, vector<32x32xf32>, vector<2x32xf32> -> vector<2x32xf32>
    %cst_36 = arith.constant dense<0.000000e+00> : vector<2x32xf32>
    %86 = tpu.matmul %80, %3, %cst_36 {dimension_numbers = #tpu.dot_dimension_numbers<[1], [0], [0], [1], [0, 0, 1, 1], [], []>} : vector<2x32xf32>, vector<32x32xf32>, vector<2x32xf32> -> vector<2x32xf32>
    %87 = arith.addf %85, %86 : vector<2x32xf32>
    %88 = arith.addf %87, %6 : vector<2x32xf32>
    %89 = math.tanh %88 : vector<2x32xf32>
    %cst_37 = arith.constant dense<0.000000e+00> : vector<2x10xf32>
    %90 = tpu.matmul %89, %7, %cst_37 {dimension_numbers = #tpu.dot_dimension_numbers<[1], [0], [0], [1], [0, 0, 1, 1], [], []>} : vector<2x32xf32>, vector<32x10xf32>, vector<2x10xf32> -> vector<2x10xf32>
    %91 = arith.addf %90, %10 : vector<2x10xf32>
    %c0_38 = arith.constant 0 : index
    %c0_39 = arith.constant 0 : index
    %92 = vector.load %arg3[%c0_38, %c0_39] : memref<2x10xf32, #tpu.memory_space<vmem>>, vector<2x10xf32>
    tpu.vector_store %arg3[%c0_38, %c0_39], %91 {strides = array<i32>} : memref<2x10xf32, #tpu.memory_space<vmem>>, vector<2x10xf32>,
    return
  }
}

</mosaic_0001>

<bundles_post_ra>
// kernel: tpu_custom_call.1
= control target key start
LH: loop header
LB: loop body
LE: loop exit
PB: predicated region body
PF: predicated region fallthrough
CT: control target
= control target key end

     0   :  { %vm50_vm0 = vcmask 130048   ;;  %v2659_v3 = vmov 0.0|0.0   ;;  %vm2660_vm1 = vmmov 0   ;;  %v2661_v10 = vmov 0.0   ;;  %s2973_s0 = inlined_call_operand.vmem [shape: f32[16,16], index: 0, kind: input, shape index: {}]   ;;  %s2974_s1 = inlined_call_operand.vmem [shape: f32[128,32], index: 1, kind: input, shape index: {}]   ;;  %s2975_s2 = inlined_call_operand.vmem [shape: f32[40,10], index: 2, kind: input, shape index: {}]   ;;  %s2976_s3 = inlined_call_operand.hbm [shape: f32[2,10], index: 3, kind: output, shape index: {}]  }
   0x1   :  { %v15_v0 = vld [vmem:[%s2974_s1] sm:$0xff]  ;;  %v16_v1 = vld [vmem:[%s2974_s1 + $0x8] sm:$0xff]  ;;  %v17_v2 = vld [vmem:[%s2974_s1 + $0x10] sm:$0xff]  ;;  %2449 = vmatprep.subr.bf16.mxu1 %v2659_v3  ;;  %2178 = vmatprep.mubr.msk.f32.mxu1 %vm2660_vm1, %v2661_v10 }
   0x2   :  { %v2445_v4 = vpack.c.bf16 %v16_v1, %v15_v0  ;;  %v18_v5 = vld [vmem:[%s2974_s1 + $0x18] sm:$0xff]  ;;  %v43_v6 = vld [vmem:[%s2973_s0] sm:$0xff]  ;;  %v20_v9 = vld [vmem:[%s2974_s1 + $0x28] sm:$0xff] }
   0x3   :  { %v2699_v7 = vpack.c.bf16 %v18_v5, %v17_v2  ;;  %2167 = vmatprep.mubr.msk.f32.mxu0 %vm50_vm0, %v43_v6  ;;  %v19_v8 = vld [vmem:[%s2974_s1 + $0x20] sm:$0xff] }
   0x4   :  { %8 = vsyncpa [#allocation3], 0  ;;  %2446 = vmatprep.subr.bf16.mxu0 %v2445_v4  ;;  %v44_v11 = vld [vmem:[%s2973_s0 + $0x8] sm:$0xff]  ;;  %v2714_v12 = vpack.c.bf16 %v20_v9, %v19_v8  ;;  %v25_v13 = vld [vmem:[%s2974_s1 + $0x58] sm:$0xff]  ;;  %vm132_vm2 = vcmask 261120   ;;  %s2662_s28 = smov [#allocation2]  }
   0x5   :  { %2451 = vmatpush3.bf16.msra.mxu1 %v2699_v7  ;;  %2448 = vmatpush3.bf16.msra.mxu0 %v2445_v4  ;;  %v26_v14 = vld [vmem:[%s2974_s1 + $0x60] sm:$0xff]  ;;  %v27_v16 = vld [vmem:[%s2974_s1 + $0x68] sm:$0xff]  ;;  %v28_v17 = vld [vmem:[%s2974_s1 + $0x70] sm:$0xff]  ;;  %s1998_s29 = sshll.u32 %s2662_s28, 4  ;;  %vm1990_vm3 = vcmask 74752   ;;  %s1999_s29 = int_to_ptr.vmem [resolvable:$true] %s1998_s29 }
   0x6   :  { %2452 = vmatprep.subr.bf16.mxu1 %v2659_v3  ;;  %2455 = vmatprep.subr.bf16.mxu0 %v2659_v3  ;;  %v2732_v15 = vpack.c.bf16 %v26_v14, %v25_v13  ;;  %v2742_v18 = vpack.c.bf16 %v28_v17, %v27_v16  ;;  %v21_v19 = vld [vmem:[%s2974_s1 + $0x38] sm:$0xff]  ;;  %v22_v20 = vld [vmem:[%s2974_s1 + $0x40] sm:$0xff]  ;;  %v23_v21 = vld [vmem:[%s2974_s1 + $0x48] sm:$0xff]  ;;  %s2635_s30 = scalar_lea.vmem %s1999_s29, 32  ;;  %p2640_p1 = scmp.lt.s32.totalorder %s1999_s29, %s1999_s29 }
   0x7   :  { %v2755_v22 = vpack.c.bf16 %v22_v20, %v21_v19  ;;  %v24_v23 = vld [vmem:[%s2974_s1 + $0x50] sm:$0xff]  ;;  %v2798_v36 = vld [vmem:[%s2974_s1 + $0x78] ss:$0 sm:$0xff]  ;;  %p2636_p0 = scmp.ne.s32.totalorder %s1999_s29, %s2635_s30  ;;  %p2641_p2 = scmp.lt.s32.totalorder %s2635_s30, %s2635_s30 }
   0x8   :  { %2168 = vmatmul.mubr.msk.f32.vlgmr.msra.gmra.mrb[0].mxu0 %vm50_vm0, %v44_v11  ;;  %v2762_v24 = vpack.c.bf16 %v24_v23, %v23_v21  ;;  %v2008_v25 = vld [vmem:[%s2974_s1 + $0x30] ss:$0 sm:$0xff] }
   0x9   :  { %2454 = vmatpush3.bf16.msra.mxu1 %v2714_v12  ;;  %2189 = vmatprep.mubr.msk.f32.mxu0 %vm2660_vm1, %v2661_v10  ;;  %p2642_p3 = por %p2641_p2, %p2640_p1 }
   0xa   :  { %2461 = vmatprep.subr.bf16.mxu1 %v2659_v3  ;;  %2457 = vmatpush3.bf16.msra.mxu0 %v2732_v15 }
   0xb   :  { %2458 = vmatprep.subr.bf16.mxu0 %v2659_v3  ;;  %p2643_p4 = pnand %p2642_p3, %p2636_p0 }
   0xc   :  { %2179 = vmatmul.mubr.f32.vlgmr.msra.gmra.mrb[0].mxu1 %v2661_v10 }
   0xd   :  { %2200 = vmatprep.mubr.msk.f32.mxu1 %vm2660_vm1, %v2661_v10  ;;  %2463 = vmatpush3.bf16.msra.mxu1 %v2755_v22 }
   0xe   :  { %2460 = vmatpush3.bf16.msra.mxu0 %v2742_v18  ;;  %2464 = vmatprep.subr.bf16.mxu1 %v2659_v3 }
   0xf   :  { %2467 = vmatprep.subr.bf16.mxu0 %v2659_v3 }
  0x11   :  { %2190 = vmatmul.mubr.f32.vlgmr.msra.gmra.mrb[2].mxu0 %v2661_v10  ;;  %2466 = vmatpush3.bf16.msra.mxu1 %v2762_v24 }
  0x12   :  { %2469 = vmatpush3.bf16.msra.mxu0 %v2699_v7  ;;  %2211 = vmatprep.mubr.msk.f32.mxu0 %vm2660_vm1, %v2661_v10 }
  0x13   :  { %2470 = vmatprep.subr.bf16.mxu0 %v2659_v3  ;;  %2473 = vmatprep.subr.bf16.mxu1 %v2659_v3 }
  0x16   :  { %2472 = vmatpush3.bf16.msra.mxu0 %v2714_v12 }
  0x17   :  { %2479 = vmatprep.subr.bf16.mxu0 %v2659_v3 }
  0xdb   :  { %v2169_v26 = vpop.f32.mrb[0].mxu0 }
  0xdc   :  { %v2776_v27 = vadd.f32 %v2169_v26, %v2008_v25  ;;  %v123_v28 = vpop.f32.mrb[1].mxu0 }
  0xdd   :  { %v2778_v29 = vadd.f32 %v2008_v25, %v123_v28 }
  0xdf   :  { %v202_v30 = vpop.f32.mrb[0].mxu1 }
  0xe0   :  { %v206_v31 = vadd.f32 %v202_v30, %v2778_v29  ;;  %v2180_v32 = vpop.f32.mrb[1].mxu1 }
  0xe2   :  { %2603 = vtanh.f32 %v206_v31 }
  0xe4   :  { %v274_v34 = vpop.f32.mrb[2].mxu0 }
  0xe5   :  { %v2191_v35 = vpop.f32.mrb[3].mxu0 }
  0xec   :  { %v2604_v33 = vpop.eup %2603 }
  0xed   :  { %2201 = vmatmul.mubr.msk.f32.vlgmr.msra.gmra.mrb[2].mxu1 %vm132_vm2, %v2604_v33  ;;  %2212 = vmatmul.mubr.msk.f32.vlgmr.msra.gmra.mrb[4].mxu0 %vm132_vm2, %v2604_v33 }
  0xee   :  { %2475 = vmatpush3.bf16.msra.mxu1 %v2732_v15  ;;  %2481 = vmatpush3.bf16.msra.mxu0 %v2755_v22 }
  0xef   :  { %2476 = vmatprep.subr.bf16.mxu1 %v2659_v3  ;;  %2482 = vmatprep.subr.bf16.mxu0 %v2659_v3 }
  0xf0   :  { %2222 = vmatprep.mubr.msk.f32.mxu1 %vm2660_vm1, %v2661_v10  ;;  %2233 = vmatprep.mubr.msk.f32.mxu0 %vm2660_vm1, %v2661_v10 }
  0xf2   :  { %2478 = vmatpush3.bf16.msra.mxu1 %v2742_v18  ;;  %2484 = vmatpush3.bf16.msra.mxu0 %v2762_v24 }
  0xf3   :  { %2485 = vmatprep.subr.bf16.mxu1 %v2659_v3  ;;  %2491 = vmatprep.subr.bf16.mxu0 %v2659_v3 }
 0x1c0   :  { %v347_v37 = vpop.f32.mrb[2].mxu1  ;;  %v419_v38 = vpop.f32.mrb[4].mxu0 }
 0x1c1   :  { %v348_v39 = vadd.f32 %v347_v37, %v274_v34  ;;  %v424_v40 = vrot.slane %v419_v38, 6  ;;  %v2202_v41 = vpop.f32.mrb[3].mxu1  ;;  %v2213_v42 = vpop.f32.mrb[5].mxu0 }
 0x1c3   :  { %v351_v43 = vadd.f32 %v2798_v36, %v348_v39  ;;  %v426_v44 = vadd.f32 %v424_v40, %v2778_v29 }
 0x1c5   :  { %2605 = vtanh.f32 %v351_v43 }
 0x1c6   :  { %2607 = vtanh.f32 %v426_v44 }
 0x1cf   :  { %v2606_v45 = vpop.eup %2605 }
 0x1d0   :  { %v2608_v46 = vpop.eup %2607  ;;  %2223 = vmatmul.mubr.msk.f32.vlgmr.msra.gmra.mrb[4].mxu1 %vm132_vm2, %v2606_v45 }
 0x1d1   :  { %v502_v47 = vrot.slane %v2608_v46, 2  ;;  %2487 = vmatpush3.bf16.msra.mxu1 %v2699_v7  ;;  %2244 = vmatprep.mubr.msk.f32.mxu1 %vm2660_vm1, %v2661_v10 }
 0x1d2   :  { %2488 = vmatprep.subr.bf16.mxu1 %v2659_v3 }
 0x1d3   :  { %2234 = vmatmul.mubr.msk.f32.vlgmr.msra.gmra.mrb[6].mxu0 %vm132_vm2, %v502_v47 }
 0x1d4   :  { %2493 = vmatpush3.bf16.msra.mxu0 %v2732_v15  ;;  %2255 = vmatprep.mubr.msk.f32.mxu0 %vm2660_vm1, %v2661_v10 }
 0x1d5   :  { %2490 = vmatpush3.bf16.msra.mxu1 %v2714_v12  ;;  %2494 = vmatprep.subr.bf16.mxu0 %v2659_v3 }
 0x1d6   :  { %2497 = vmatprep.subr.bf16.mxu1 %v2659_v3 }
 0x1d8   :  { %2245 = vmatmul.mubr.msk.f32.vlgmr.msra.gmra.mrb[6].mxu1 %vm132_vm2, %v502_v47  ;;  %2496 = vmatpush3.bf16.msra.mxu0 %v2742_v18 }
 0x1d9   :  { %2503 = vmatprep.subr.bf16.mxu0 %v2659_v3  ;;  %2499 = vmatpush3.bf16.msra.mxu1 %v2755_v22 }
 0x1da   :  { %2500 = vmatprep.subr.bf16.mxu1 %v2659_v3  ;;  %2266 = vmatprep.mubr.msk.f32.mxu1 %vm2660_vm1, %v2661_v10 }
 0x1dd   :  { %2502 = vmatpush3.bf16.msra.mxu1 %v2762_v24 }
 0x1de   :  { %2509 = vmatprep.subr.bf16.mxu1 %v2659_v3 }
 0x2a3   :  { %v497_v48 = vpop.f32.mrb[4].mxu1 }
 0x2a4   :  { %v2224_v49 = vpop.f32.mrb[5].mxu1 }
 0x2a6   :  { %v571_v50 = vpop.f32.mrb[6].mxu0 }
 0x2a7   :  { %v572_v51 = vadd.f32 %v571_v50, %v497_v48  ;;  %v2235_v52 = vpop.f32.mrb[7].mxu0 }
 0x2a9   :  { %v575_v53 = vadd.f32 %v2798_v36, %v572_v51 }
 0x2ab   :  { %2609 = vtanh.f32 %v575_v53  ;;  %v643_v54 = vpop.f32.mrb[6].mxu1 }
 0x2ac   :  { %v648_v55 = vrot.slane %v643_v54, 4  ;;  %v2246_v56 = vpop.f32.mrb[7].mxu1 }
 0x2ae   :  { %v650_v57 = vadd.f32 %v648_v55, %v2778_v29 }
 0x2b0   :  { %2611 = vtanh.f32 %v650_v57 }
 0x2b5   :  { %v2610_v58 = vpop.eup %2609 }
 0x2b6   :  { %2256 = vmatmul.mubr.msk.f32.vlgmr.msra.gmra.mrb[8].mxu0 %vm132_vm2, %v2610_v58 }
 0x2b7   :  { %2505 = vmatpush3.bf16.msra.mxu0 %v2699_v7  ;;  %2277 = vmatprep.mubr.msk.f32.mxu0 %vm2660_vm1, %v2661_v10 }
 0x2b8   :  { %2506 = vmatprep.subr.bf16.mxu0 %v2659_v3 }
 0x2ba   :  { %v2612_v59 = vpop.eup %2611 }
 0x2bb   :  { %v726_v60 = vrot.slane %v2612_v59, 4  ;;  %2508 = vmatpush3.bf16.msra.mxu0 %v2714_v12 }
 0x2bc   :  { %2515 = vmatprep.subr.bf16.mxu0 %v2659_v3 }
 0x2bd   :  { %2267 = vmatmul.mubr.msk.f32.vlgmr.msra.gmra.mrb[8].mxu1 %vm132_vm2, %v726_v60 }
 0x2be   :  { %2278 = vmatmul.mubr.msk.f32.vlgmr.msra.gmra.mrb[10].mxu0 %vm132_vm2, %v726_v60  ;;  %2511 = vmatpush3.bf16.msra.mxu1 %v2732_v15 }
 0x2bf   :  { %2512 = vmatprep.subr.bf16.mxu1 %v2659_v3  ;;  %2517 = vmatpush3.bf16.msra.mxu0 %v2755_v22 }
 0x2c0   :  { %2518 = vmatprep.subr.bf16.mxu0 %v2659_v3  ;;  %2288 = vmatprep.mubr.msk.f32.mxu1 %vm2660_vm1, %v2661_v10 }
 0x2c1   :  { %2299 = vmatprep.mubr.msk.f32.mxu0 %vm2660_vm1, %v2661_v10 }
 0x2c2   :  { %2514 = vmatpush3.bf16.msra.mxu1 %v2742_v18 }
 0x2c3   :  { %2520 = vmatpush3.bf16.msra.mxu0 %v2762_v24  ;;  %2521 = vmatprep.subr.bf16.mxu1 %v2659_v3 }
 0x2c4   :  { %2527 = vmatprep.subr.bf16.mxu0 %v2659_v3 }
 0x389   :  { %v721_v61 = vpop.f32.mrb[8].mxu0 }
 0x38a   :  { %v2257_v62 = vpop.f32.mrb[9].mxu0 }
 0x390   :  { %v795_v63 = vpop.f32.mrb[8].mxu1 }
 0x391   :  { %v796_v0 = vadd.f32 %v795_v63, %v721_v61  ;;  %v867_v1 = vpop.f32.mrb[10].mxu0  ;;  %v2268_v2 = vpop.f32.mrb[9].mxu1 }
 0x392   :  { %v872_v4 = vrot.slane %v867_v1, 2  ;;  %v2279_v5 = vpop.f32.mrb[11].mxu0  ;;  %v35_v1 = vld [vmem:[%s2975_s2 + $0x8] sm:$0xff] }
 0x393   :  { %v799_v6 = vadd.f32 %v2798_v36, %v796_v0  ;;  %v34_v0 = vld [vmem:[%s2975_s2] sm:$0xff] }
 0x394   :  { %v874_v8 = vadd.f32 %v872_v4, %v2778_v29  ;;  %v2594_v2 = vpack.c.bf16 %v35_v1, %v34_v0 }
 0x395   :  { %2613 = vtanh.f32 %v799_v6 }
 0x396   :  { %2615 = vtanh.f32 %v874_v8 }
 0x39f   :  { %v2614_v9 = vpop.eup %2613 }
 0x3a0   :  { %v2616_v11 = vpop.eup %2615  ;;  %2289 = vmatmul.mubr.msk.f32.vlgmr.msra.gmra.mrb[10].mxu1 %vm132_vm2, %v2614_v9 }
 0x3a1   :  { %v950_v13 = vrot.slane %v2616_v11, 6  ;;  %2523 = vmatpush3.bf16.msra.mxu1 %v2699_v7  ;;  %2310 = vmatprep.mubr.msk.f32.mxu1 %vm2660_vm1, %v2661_v10 }
 0x3a2   :  { %2524 = vmatprep.subr.bf16.mxu1 %v2659_v3 }
 0x3a3   :  { %2300 = vmatmul.mubr.msk.f32.vlgmr.msra.gmra.mrb[12].mxu0 %vm132_vm2, %v950_v13 }
 0x3a4   :  { %2529 = vmatpush3.bf16.msra.mxu0 %v2732_v15  ;;  %2321 = vmatprep.mubr.msk.f32.mxu0 %vm2660_vm1, %v2661_v10 }
 0x3a5   :  { %2526 = vmatpush3.bf16.msra.mxu1 %v2714_v12  ;;  %2530 = vmatprep.subr.bf16.mxu0 %v2659_v3 }
 0x3a6   :  { %2533 = vmatprep.subr.bf16.mxu1 %v2659_v3 }
 0x3a8   :  { %2311 = vmatmul.mubr.msk.f32.vlgmr.msra.gmra.mrb[12].mxu1 %vm132_vm2, %v950_v13  ;;  %2532 = vmatpush3.bf16.msra.mxu0 %v2742_v18 }
 0x3a9   :  { %2535 = vmatpush3.bf16.msra.mxu1 %v2755_v22  ;;  %2539 = vmatprep.subr.bf16.mxu0 %v2659_v3 }
 0x3aa   :  { %2536 = vmatprep.subr.bf16.mxu1 %v2659_v3  ;;  %2332 = vmatprep.mubr.msk.f32.mxu1 %vm2660_vm1, %v2661_v10 }
 0x3ad   :  { %2538 = vmatpush3.bf16.msra.mxu1 %v2762_v24 }
 0x3ae   :  { %2545 = vmatprep.subr.bf16.mxu1 %v2659_v3 }
 0x473   :  { %v945_v14 = vpop.f32.mrb[10].mxu1 }
 0x474   :  { %v2290_v16 = vpop.f32.mrb[11].mxu1 }
 0x475   :  { %v2007_v16 = vld [vmem:[%s2975_s2 + $0x20] ss:$0 sm:$0xff] }
 0x476   :  { %v1019_v17 = vpop.f32.mrb[12].mxu0 }
 0x477   :  { %v1020_v19 = vadd.f32 %v1019_v17, %v945_v14  ;;  %v2301_v20 = vpop.f32.mrb[13].mxu0 }
 0x479   :  { %v1023_v21 = vadd.f32 %v2798_v36, %v1020_v19 }
 0x47b   :  { %2617 = vtanh.f32 %v1023_v21  ;;  %v1091_v23 = vpop.f32.mrb[12].mxu1 }
 0x47c   :  { %v1095_v25 = vadd.f32 %v1091_v23, %v2776_v27  ;;  %v2312_v26 = vpop.f32.mrb[13].mxu1 }
 0x47e   :  { %2619 = vtanh.f32 %v1095_v25 }
 0x485   :  { %v2618_v28 = vpop.eup %2617 }
 0x486   :  { %2322 = vmatmul.mubr.msk.f32.vlgmr.msra.gmra.mrb[14].mxu0 %vm132_vm2, %v2618_v28 }
 0x487   :  { %2541 = vmatpush3.bf16.msra.mxu0 %v2699_v7  ;;  %2343 = vmatprep.mubr.msk.f32.mxu0 %vm2660_vm1, %v2661_v10 }
 0x488   :  { %v2620_v29 = vpop.eup %2619  ;;  %2542 = vmatprep.subr.bf16.mxu0 %v2659_v3 }
 0x489   :  { %2333 = vmatmul.mubr.msk.f32.vlgmr.msra.gmra.mrb[14].mxu1 %vm132_vm2, %v2620_v29 }
 0x48a   :  { %2547 = vmatpush3.bf16.msra.mxu1 %v2732_v15  ;;  %2354 = vmatprep.mubr.msk.f32.mxu1 %vm2660_vm1, %v2661_v10 }
 0x48b   :  { %2544 = vmatpush3.bf16.msra.mxu0 %v2714_v12  ;;  %2548 = vmatprep.subr.bf16.mxu1 %v2659_v3 }
 0x48c   :  { %2551 = vmatprep.subr.bf16.mxu0 %v2659_v3 }
 0x48e   :  { %2344 = vmatmul.mubr.msk.f32.vlgmr.msra.gmra.mrb[16].mxu0 %vm132_vm2, %v2620_v29  ;;  %2550 = vmatpush3.bf16.msra.mxu1 %v2742_v18 }
 0x48f   :  { %2553 = vmatpush3.bf16.msra.mxu0 %v2755_v22  ;;  %2557 = vmatprep.subr.bf16.mxu1 %v2659_v3 }
 0x490   :  { %2554 = vmatprep.subr.bf16.mxu0 %v2659_v3  ;;  %2365 = vmatprep.mubr.msk.f32.mxu0 %vm2660_vm1, %v2661_v10 }
 0x493   :  { %2556 = vmatpush3.bf16.msra.mxu0 %v2762_v24 }
 0x494   :  { %2563 = vmatprep.subr.bf16.mxu0 %v2659_v3 }
 0x559   :  { %v1166_v30 = vpop.f32.mrb[14].mxu0 }
 0x55a   :  { %v2323_v31 = vpop.f32.mrb[15].mxu0 }
 0x55c   :  { %v1239_v32 = vpop.f32.mrb[14].mxu1 }
 0x55d   :  { %v1240_v33 = vadd.f32 %v1239_v32, %v1166_v30  ;;  %v2334_v34 = vpop.f32.mrb[15].mxu1 }
 0x55f   :  { %v1243_v35 = vadd.f32 %v2798_v36, %v1240_v33 }
 0x561   :  { %2621 = vtanh.f32 %v1243_v35  ;;  %v1311_v37 = vpop.f32.mrb[16].mxu0 }
 0x562   :  { %v1316_v38 = vrot.slane %v1311_v37, 6  ;;  %v2345_v39 = vpop.f32.mrb[17].mxu0 }
 0x564   :  { %v1318_v40 = vadd.f32 %v1316_v38, %v2776_v27 }
 0x566   :  { %2623 = vtanh.f32 %v1318_v40 }
 0x56b   :  { %v2622_v41 = vpop.eup %2621 }
 0x56c   :  { %2355 = vmatmul.mubr.msk.f32.vlgmr.msra.gmra.mrb[16].mxu1 %vm132_vm2, %v2622_v41 }
 0x56d   :  { %2559 = vmatpush3.bf16.msra.mxu1 %v2699_v7  ;;  %2376 = vmatprep.mubr.msk.f32.mxu1 %vm2660_vm1, %v2661_v10 }
 0x56e   :  { %2560 = vmatprep.subr.bf16.mxu1 %v2659_v3 }
 0x570   :  { %v2624_v42 = vpop.eup %2623 }
 0x571   :  { %v1394_v43 = vrot.slane %v2624_v42, 2  ;;  %2562 = vmatpush3.bf16.msra.mxu1 %v2714_v12 }
 0x572   :  { %2569 = vmatprep.subr.bf16.mxu1 %v2659_v3 }
 0x573   :  { %2366 = vmatmul.mubr.msk.f32.vlgmr.msra.gmra.mrb[18].mxu0 %vm132_vm2, %v1394_v43 }
 0x574   :  { %2377 = vmatmul.mubr.msk.f32.vlgmr.msra.gmra.mrb[18].mxu1 %vm132_vm2, %v1394_v43  ;;  %2565 = vmatpush3.bf16.msra.mxu0 %v2732_v15 }
 0x575   :  { %2566 = vmatprep.subr.bf16.mxu0 %v2659_v3  ;;  %2571 = vmatpush3.bf16.msra.mxu1 %v2755_v22 }
 0x576   :  { %2387 = vmatprep.mubr.msk.f32.mxu0 %vm2660_vm1, %v2661_v10  ;;  %2572 = vmatprep.subr.bf16.mxu1 %v2659_v3 }
 0x577   :  { %2398 = vmatprep.mubr.msk.f32.mxu1 %vm2660_vm1, %v2661_v10 }
 0x578   :  { %2568 = vmatpush3.bf16.msra.mxu0 %v2742_v18 }
 0x579   :  { %2575 = vmatprep.subr.bf16.mxu0 %v2659_v3  ;;  %2574 = vmatpush3.bf16.msra.mxu1 %v2762_v24 }
 0x57a   :  { %2581 = vmatprep.subr.bf16.mxu1 %v2659_v3 }
 0x63f   :  { %v1389_v44 = vpop.f32.mrb[16].mxu1 }
 0x640   :  { %v2356_v45 = vpop.f32.mrb[17].mxu1 }
 0x646   :  { %v1463_v46 = vpop.f32.mrb[18].mxu0 }
 0x647   :  { %v1464_v47 = vadd.f32 %v1463_v46, %v1389_v44  ;;  %v2367_v48 = vpop.f32.mrb[19].mxu0  ;;  %v1535_v49 = vpop.f32.mrb[18].mxu1 }
 0x648   :  { %v1540_v50 = vrot.slane %v1535_v49, 4  ;;  %v2378_v51 = vpop.f32.mrb[19].mxu1 }
 0x649   :  { %v1467_v52 = vadd.f32 %v2798_v36, %v1464_v47 }
 0x64a   :  { %v1542_v53 = vadd.f32 %v1540_v50, %v2776_v27 }
 0x64b   :  { %2625 = vtanh.f32 %v1467_v52 }
 0x64c   :  { %2627 = vtanh.f32 %v1542_v53 }
 0x655   :  { %v2626_v54 = vpop.eup %2625 }
 0x656   :  { %v2628_v55 = vpop.eup %2627  ;;  %2388 = vmatmul.mubr.msk.f32.vlgmr.msra.gmra.mrb[20].mxu0 %vm132_vm2, %v2626_v54 }
 0x657   :  { %v1618_v56 = vrot.slane %v2628_v55, 4  ;;  %2577 = vmatpush3.bf16.msra.mxu0 %v2699_v7  ;;  %2409 = vmatprep.mubr.msk.f32.mxu0 %vm2660_vm1, %v2661_v10 }
 0x658   :  { %2578 = vmatprep.subr.bf16.mxu0 %v2659_v3 }
 0x659   :  { %2399 = vmatmul.mubr.msk.f32.vlgmr.msra.gmra.mrb[20].mxu1 %vm132_vm2, %v1618_v56 }
 0x65a   :  { %2583 = vmatpush3.bf16.msra.mxu1 %v2732_v15  ;;  %2420 = vmatprep.mubr.msk.f32.mxu1 %vm2660_vm1, %v2661_v10 }
 0x65b   :  { %2580 = vmatpush3.bf16.msra.mxu0 %v2714_v12  ;;  %2584 = vmatprep.subr.bf16.mxu1 %v2659_v3 }
 0x65c   :  { %2587 = vmatprep.subr.bf16.mxu0 %v2659_v3 }
 0x65e   :  { %2410 = vmatmul.mubr.msk.f32.vlgmr.msra.gmra.mrb[22].mxu0 %vm132_vm2, %v1618_v56  ;;  %2586 = vmatpush3.bf16.msra.mxu1 %v2742_v18 }
 0x65f   :  { %2589 = vmatpush3.bf16.msra.mxu0 %v2755_v22  ;;  %2431 = vmatprep.mubr.msk.f32.mxu0 %vm2660_vm1, %v2661_v10 }
 0x660   :  { %2590 = vmatprep.subr.bf16.mxu0 %v2659_v3  ;;  %2593 = vmatprep.subr.bf16.mxu1 %v2659_v3 }
 0x663   :  { %2592 = vmatpush3.bf16.msra.mxu0 %v2762_v24 }
 0x729   :  { %v1613_v7 = vpop.f32.mrb[20].mxu0 }
 0x72a   :  { %v2389_v12 = vpop.f32.mrb[21].mxu0 }
 0x72c   :  { %v1687_v15 = vpop.f32.mrb[20].mxu1 }
 0x72d   :  { %v1688_v57 = vadd.f32 %v1687_v15, %v1613_v7  ;;  %v2400_v58 = vpop.f32.mrb[21].mxu1 }
 0x72f   :  { %v1691_v59 = vadd.f32 %v2798_v36, %v1688_v57 }
 0x731   :  { %2629 = vtanh.f32 %v1691_v59  ;;  %v1759_v18 = vpop.f32.mrb[22].mxu0 }
 0x732   :  { %v1764_v60 = vrot.slane %v1759_v18, 2  ;;  %v2411_v22 = vpop.f32.mrb[23].mxu0 }
 0x734   :  { %v1766_v61 = vadd.f32 %v1764_v60, %v2776_v27  ;;  %v36_v27 = vld [vmem:[%s2975_s2 + $0x10] sm:$0xff] }
 0x736   :  { %2631 = vtanh.f32 %v1766_v61 }
 0x73b   :  { %v2630_v62 = vpop.eup %2629 }
 0x73c   :  { %2421 = vmatmul.mubr.msk.f32.vlgmr.msra.gmra.mrb[22].mxu1 %vm132_vm2, %v2630_v62 }
 0x73d   :  { %2442 = vmatprep.mubr.msk.f32.mxu1 %vm2660_vm1, %v2661_v10  ;;  %v37_v10 = vld [vmem:[%s2975_s2 + $0x18] sm:$0xff]  ;;  %2595 = vmatpush3.bf16.msra.mxu1 %v2594_v2 }
 0x73e   :  { %v2597_v4 = vpack.c.bf16 %v37_v10, %v36_v27  ;;  %2596 = vmatprep.subr.bf16.mxu1 %v2659_v3 }
 0x740   :  { %v2632_v24 = vpop.eup %2631 }
 0x741   :  { %v1842_v63 = vrot.slane %v2632_v24, 6  ;;  %2598 = vmatpush3.bf16.msra.mxu1 %v2597_v4 }
 0x743   :  { %2432 = vmatmul.mubr.msk.f32.vlgmr.msra.gmra.mrb[24].mxu0 %vm132_vm2, %v1842_v63 }
 0x80f   :  { %v1837_v5 = vpop.f32.mrb[22].mxu1 }
 0x810   :  { %v2422_v6 = vpop.f32.mrb[23].mxu1 }
 0x816   :  { %v1911_v8 = vpop.f32.mrb[24].mxu0 }
 0x817   :  { %v1912_v9 = vadd.f32 %v1911_v8, %v1837_v5  ;;  %v2433_v11 = vpop.f32.mrb[25].mxu0 }
 0x819   :  { %v1915_v13 = vadd.f32 %v2798_v36, %v1912_v9 }
 0x81b   :  { %2633 = vtanh.f32 %v1915_v13 }
 0x825   :  { %v2634_v14 = vpop.eup %2633 }
 0x826   :  { %2443 = vmatmul.mubr.msk.f32.vlgmr.msra.gmra.mrb[24].mxu1 %vm132_vm2, %v2634_v14 }
 0x8f9   :  { %v1986_v17 = vpop.f32.mrb[24].mxu1 }
 0x8fa   :  { %v1987_v3 = vadd.f32 %v2007_v16, %v1986_v17  ;;  %v2444_v19 = vpop.f32.mrb[25].mxu1 }
 0x8fc   :  { %1991 = vst.msk [vmem:[#allocation2] sm:$0x3] %vm1990_vm3, %v1987_v3 }
 0x8fd   :  { %2646 = shalt.err (!%p2643_p4)
}
 0x8fe   :  { %s2647_s6 = scalar_lea.hbm %s2976_s3, 32 }
 0x8ff   :  { %p2648_p5 = scmp.ne.s32.totalorder %s2976_s3, %s2647_s6  ;;  %p2651_p6 = scmp.lt.u32.totalorder %s2647_s6, %s2976_s3 }
 0x901   :  { %p2653_p7 = pnand %p2651_p6, %p2648_p5 }
 0x903   :  { %2656 = shalt.err (!%p2653_p7)
}
 0x904   :  { %2001 = dma.vmem_to_hbm [thread:$0]  %s1999_s29, 32, %s2976_s3, [#allocation3]  }
 0x905   :  { %2657 = dma.done.wait [#allocation3], 32  }
 0x906   :  { %2658 = vsyncadd [#allocation3], 4294967264 }
 0x907   :  { %2005 = vsyncpa [#allocation3], 1 }

</bundles_post_ra>
